<compile_context>
chip_gen: v5e
topology: v5e:2x2
jax: 0.10.0
libtpu: 0.0.40
codegen_flags: <defaults>
</compile_context>

<pallas_src>
import functools

import jax
import jax.numpy as jnp
from jax import lax
from jax.experimental import pallas as pl
from jax.experimental.pallas import tpu as pltpu

_PADS = (2, 4, 6)  # -> pooling windows 5x5, 9x9, 13x13, stride 1, "same"


def _neg_limit(dtype):
    """Most-negative value for max-pool padding (dtype generic)."""
    if jnp.issubdtype(dtype, jnp.floating):
        return float("-inf")
    return int(jnp.iinfo(dtype).min)


def _spp_kernel(col_ref, x_ref, o_ref, *, H, W, slab):
    TC, HW = x_ref.shape
    n_slabs = TC // slab
    neg = _neg_limit(x_ref.dtype)

    # ---- Hoisted boundary masks (one sublane slab, shared by all slabs and
    # all three pools).  The int planes used to build them die immediately;
    # only four bool planes stay live across the slab loop.
    lane = lax.broadcasted_iota(jnp.int32, (slab, HW), 1)     # flat index p
    col = jnp.broadcast_to(col_ref[...], (slab, HW))          # p mod W
    w_lo = col >= 1              # left  neighbour (p-1) is in the same row
    w_hi = col < (W - 1)         # right neighbour (p+1) is in the same row
    h_lo = lane >= W             # row above exists (p-W valid)
    h_hi = lane < (H - 1) * W    # row below exists (p+W valid)

    # Per-axis 3-window "same" max (stride 1, -inf padding).  roll is
    # circular; wrapped elements are neutralized by the hoisted masks.
    def max3_w(v):
        fwd = pltpu.roll(v, shift=HW - 1, axis=1)   # lane p <- element p+1
        bwd = pltpu.roll(v, shift=1, axis=1)        # lane p <- element p-1
        return jnp.maximum(jnp.maximum(v, jnp.where(w_hi, fwd, neg)),
                           jnp.where(w_lo, bwd, neg))

    def max3_h(v):
        fwd = pltpu.roll(v, shift=HW - W, axis=1)   # lane p <- element p+W
        bwd = pltpu.roll(v, shift=W, axis=1)        # lane p <- element p-W
        return jnp.maximum(jnp.maximum(v, jnp.where(h_hi, fwd, neg)),
                           jnp.where(h_lo, bwd, neg))

    def pool5(v):  # 5x5 stride-1 "same" max pool, separable, 3∘3 per axis
        return max3_h(max3_h(max3_w(max3_w(v))))

    # Slab loop: bounds live ranges to a (slab, HW) working set per iteration
    # while keeping the big DMA block for HBM efficiency.
    def slab_body(i, carry):
        c0 = i * slab                               # sublane-aligned (slab|TC)
        x = x_ref[pl.ds(c0, slab), :]
        o_ref[0, pl.ds(c0, slab), :] = x            # identity branch
        p5 = pool5(x)                               # 5x5
        o_ref[1, pl.ds(c0, slab), :] = p5
        p9 = pool5(p5)                              # 9x9  = 5∘5
        o_ref[2, pl.ds(c0, slab), :] = p9
        o_ref[3, pl.ds(c0, slab), :] = pool5(p9)    # 13x13 = 5∘5∘5
        return carry

    lax.fori_loop(0, n_slabs, slab_body, 0, unroll=True)


def _pick_channel_tile(N, C, HW, itemsize, channel_block):
    """Channel tile: big for DMA efficiency, bounded for VMEM (v7x), split so
    v7x's two TensorCores both get grid steps when possible."""
    if C <= 8:
        return C
    # Keep the double-buffered (1 input + 4 output) block set under ~12 MiB:
    # safe under every generation's scoped-VMEM default without raising
    # vmem_limit_bytes (v5e 16 MiB, v6e/v7x 32 MiB, v7x 64 MiB physical).
    cap = (12 * 1024 * 1024) // (2 * 5 * HW * itemsize)
    cap = max(8, (cap // 8) * 8)
    tc = min(C, channel_block, cap)
    # v7x megacore: guarantee at least 2 parallel grid steps.
    if N == 1 and tc >= C:
        tc = (C + 1) // 2
    if tc < C:  # a tile that does not cover C must be sublane (8) aligned
        tc = max(8, (tc // 8) * 8)
    return min(tc, C)


def spp(x, *, channel_block=128):
    """Darknet SPP: concat([x, maxpool5(x), maxpool9(x), maxpool13(x)], dim=1)."""
    N, C, H, W = x.shape
    HW = H * W
    itemsize = jnp.dtype(x.dtype).itemsize
    TC = _pick_channel_tile(N, C, HW, itemsize, channel_block)
    slab = 8 if TC % 8 == 0 else TC            # sublane slab per inner step

    x_r = x.reshape(N, C, HW)                  # free row-major reshape
    # Tiny precomputed column-within-row index (avoids in-kernel integer mod);
    # consumed once per grid step to build the four boundary masks.
    col = (jnp.arange(HW, dtype=jnp.int32) % W).reshape(1, HW)

    grid = (N, pl.cdiv(C, TC))
    out = pl.pallas_call(
        functools.partial(_spp_kernel, H=H, W=W, slab=slab),
        out_shape=jax.ShapeDtypeStruct((N, 4, C, HW), x.dtype),
        grid=grid,
        in_specs=[
            pl.BlockSpec((1, HW), lambda n, cb: (0, 0)),
            pl.BlockSpec((pl.Squeezed(), TC, HW), lambda n, cb: (n, cb, 0)),
        ],
        out_specs=pl.BlockSpec((pl.Squeezed(), 4, TC, HW),
                               lambda n, cb: (n, 0, cb, 0)),
        compiler_params=pltpu.CompilerParams(
            dimension_semantics=("parallel", "parallel")),
    )(col, x_r)

    # (N, 4, C, H*W) -> (N, 4*C, H, W): branch-major == torch.cat(dim=1) order.
    # NOTE: when H*W is not a multiple of 128 (13x13, 19x19, ...) the lane axis
    # is physically padded; the masks keep results correct, at some lane waste.
    return out.reshape(N, 4 * C, H, W)


def spp_ref(x):
    """Pure-JAX reference using lax.reduce_window (float inputs)."""
    outs = [x]
    for p in _PADS:
        k = 2 * p + 1
        outs.append(lax.reduce_window(
            x, -jnp.inf, lax.max,
            window_dimensions=(1, 1, k, k),
            window_strides=(1, 1, 1, 1),
            padding=((0, 0), (0, 0), (p, p), (p, p))))
    return jnp.concatenate(outs, axis=1)


if __name__ == "__main__":
    key = jax.random.PRNGKey(0)
    x = jax.random.normal(key, (2, 4, 16, 16), dtype=jnp.float32)

    y = spp(x)
    jax.block_until_ready(y)

    assert y.shape == (2, 16, 16, 16), y.shape
    y_ref = spp_ref(x)
    assert jnp.allclose(y, y_ref), "Pallas SPP mismatch vs reduce_window reference"

    print("KERNEL_OK")
</pallas_src>

<mosaic_0001>
module attributes {stable_mosaic.version = 11 : i64} {
  func.func @_spp_kernel(%arg0: i32, %arg1: i32, %arg2: memref<1x256xi32, #tpu.memory_space<vmem>>, %arg3: memref<1x4x256xf32, #tpu.memory_space<vmem>>, %arg4: memref<1x4x4x256xf32, #tpu.memory_space<vmem>>) attributes {dimension_semantics = [#tpu.dimension_semantics<parallel>, #tpu.dimension_semantics<parallel>], iteration_bounds = array<i64: 2, 1>, scalar_prefetch = 0 : i64, scratch_operands = 0 : i64, tpu.core_type = #tpu.core_type<tc>, window_params = [{pipeline_mode = #tpu.pipeline_mode<synchronous>, transform_indices = @transform_0, window_bounds = array<i64: 1, 256>}, {transform_indices = @transform_1, window_bounds = array<i64: 1, 4, 256>}, {transform_indices = @transform_2, window_bounds = array<i64: 1, 4, 4, 256>}]} {
    %0 = tpu.iota {dimensions = array<i32: 1>} : vector<4x256xi32>
    %c0 = arith.constant 0 : index
    %c0_0 = arith.constant 0 : index
    %1 = vector.load %arg2[%c0, %c0_0] : memref<1x256xi32, #tpu.memory_space<vmem>>, vector<1x256xi32>
    %2 = vector.shape_cast %1 : vector<1x256xi32> to vector<1x256xi32>
    %3 = vector.broadcast %2 : vector<1x256xi32> to vector<4x256xi32>
    %c1_i32 = arith.constant 1 : i32
    %4 = vector.broadcast %c1_i32 : i32 to vector<4x256xi32>
    %5 = arith.cmpi sge, %3, %4 : vector<4x256xi32>
    %c15_i32 = arith.constant 15 : i32
    %6 = vector.broadcast %c15_i32 : i32 to vector<4x256xi32>
    %7 = arith.cmpi slt, %3, %6 : vector<4x256xi32>
    %c16_i32 = arith.constant 16 : i32
    %8 = vector.broadcast %c16_i32 : i32 to vector<4x256xi32>
    %9 = arith.cmpi sge, %0, %8 : vector<4x256xi32>
    %c240_i32 = arith.constant 240 : i32
    %10 = vector.broadcast %c240_i32 : i32 to vector<4x256xi32>
    %11 = arith.cmpi slt, %0, %10 : vector<4x256xi32>
    %c0_i32 = arith.constant 0 : i32
    %c4_i32 = arith.constant 4 : i32
    %12 = arith.muli %c0_i32, %c4_i32 : i32
    %c0_1 = arith.constant 0 : index
    %13 = arith.index_cast %12 : i32 to index
    %c0_2 = arith.constant 0 : index
    %14 = vector.load %arg3[%c0_1, %13, %c0_2] : memref<1x4x256xf32, #tpu.memory_space<vmem>>, vector<1x4x256xf32>
    %15 = vector.shape_cast %14 : vector<1x4x256xf32> to vector<4x256xf32>
    %c0_3 = arith.constant 0 : index
    %c0_4 = arith.constant 0 : index
    %16 = arith.index_cast %12 : i32 to index
    %c0_5 = arith.constant 0 : index
    %17 = vector.load %arg4[%c0_3, %c0_4, %16, %c0_5] : memref<1x4x4x256xf32, #tpu.memory_space<vmem>>, vector<1x1x4x256xf32>
    %18 = vector.shape_cast %17 : vector<1x1x4x256xf32> to vector<4x256xf32>
    %19 = vector.shape_cast %15 : vector<4x256xf32> to vector<1x1x4x256xf32>
    tpu.vector_store %arg4[%c0_3, %c0_4, %16, %c0_5], %19 {strides = array<i32>} : memref<1x4x4x256xf32, #tpu.memory_space<vmem>>, vector<1x1x4x256xf32>,
    %c255_i32 = arith.constant 255 : i32
    %20 = tpu.dynamic_rotate %15 by %c255_i32 dim 1 : vector<4x256xf32>, i32 -> vector<4x256xf32>
    %c1_i32_6 = arith.constant 1 : i32
    %21 = tpu.dynamic_rotate %15 by %c1_i32_6 dim 1 : vector<4x256xf32>, i32 -> vector<4x256xf32>
    %cst = arith.constant 0xFF800000 : f32
    %22 = vector.broadcast %cst : f32 to vector<4x256xf32>
    %23 = arith.select %7, %20, %22 : vector<4x256xi1>, vector<4x256xf32>
    %24 = arith.maximumf %15, %23 : vector<4x256xf32>
    %cst_7 = arith.constant 0xFF800000 : f32
    %25 = vector.broadcast %cst_7 : f32 to vector<4x256xf32>
    %26 = arith.select %5, %21, %25 : vector<4x256xi1>, vector<4x256xf32>
    %27 = arith.maximumf %24, %26 : vector<4x256xf32>
    %c255_i32_8 = arith.constant 255 : i32
    %28 = tpu.dynamic_rotate %27 by %c255_i32_8 dim 1 : vector<4x256xf32>, i32 -> vector<4x256xf32>
    %c1_i32_9 = arith.constant 1 : i32
    %29 = tpu.dynamic_rotate %27 by %c1_i32_9 dim 1 : vector<4x256xf32>, i32 -> vector<4x256xf32>
    %cst_10 = arith.constant 0xFF800000 : f32
    %30 = vector.broadcast %cst_10 : f32 to vector<4x256xf32>
    %31 = arith.select %7, %28, %30 : vector<4x256xi1>, vector<4x256xf32>
    %32 = arith.maximumf %27, %31 : vector<4x256xf32>
    %cst_11 = arith.constant 0xFF800000 : f32
    %33 = vector.broadcast %cst_11 : f32 to vector<4x256xf32>
    %34 = arith.select %5, %29, %33 : vector<4x256xi1>, vector<4x256xf32>
    %35 = arith.maximumf %32, %34 : vector<4x256xf32>
    %c240_i32_12 = arith.constant 240 : i32
    %36 = tpu.dynamic_rotate %35 by %c240_i32_12 dim 1 : vector<4x256xf32>, i32 -> vector<4x256xf32>
    %c16_i32_13 = arith.constant 16 : i32
    %37 = tpu.dynamic_rotate %35 by %c16_i32_13 dim 1 : vector<4x256xf32>, i32 -> vector<4x256xf32>
    %cst_14 = arith.constant 0xFF800000 : f32
    %38 = vector.broadcast %cst_14 : f32 to vector<4x256xf32>
    %39 = arith.select %11, %36, %38 : vector<4x256xi1>, vector<4x256xf32>
    %40 = arith.maximumf %35, %39 : vector<4x256xf32>
    %cst_15 = arith.constant 0xFF800000 : f32
    %41 = vector.broadcast %cst_15 : f32 to vector<4x256xf32>
    %42 = arith.select %9, %37, %41 : vector<4x256xi1>, vector<4x256xf32>
    %43 = arith.maximumf %40, %42 : vector<4x256xf32>
    %c240_i32_16 = arith.constant 240 : i32
    %44 = tpu.dynamic_rotate %43 by %c240_i32_16 dim 1 : vector<4x256xf32>, i32 -> vector<4x256xf32>
    %c16_i32_17 = arith.constant 16 : i32
    %45 = tpu.dynamic_rotate %43 by %c16_i32_17 dim 1 : vector<4x256xf32>, i32 -> vector<4x256xf32>
    %cst_18 = arith.constant 0xFF800000 : f32
    %46 = vector.broadcast %cst_18 : f32 to vector<4x256xf32>
    %47 = arith.select %11, %44, %46 : vector<4x256xi1>, vector<4x256xf32>
    %48 = arith.maximumf %43, %47 : vector<4x256xf32>
    %cst_19 = arith.constant 0xFF800000 : f32
    %49 = vector.broadcast %cst_19 : f32 to vector<4x256xf32>
    %50 = arith.select %9, %45, %49 : vector<4x256xi1>, vector<4x256xf32>
    %51 = arith.maximumf %48, %50 : vector<4x256xf32>
    %c0_20 = arith.constant 0 : index
    %c1 = arith.constant 1 : index
    %52 = arith.index_cast %12 : i32 to index
    %c0_21 = arith.constant 0 : index
    %53 = vector.load %arg4[%c0_20, %c1, %52, %c0_21] : memref<1x4x4x256xf32, #tpu.memory_space<vmem>>, vector<1x1x4x256xf32>
    %54 = vector.shape_cast %53 : vector<1x1x4x256xf32> to vector<4x256xf32>
    %55 = vector.shape_cast %51 : vector<4x256xf32> to vector<1x1x4x256xf32>
    tpu.vector_store %arg4[%c0_20, %c1, %52, %c0_21], %55 {strides = array<i32>} : memref<1x4x4x256xf32, #tpu.memory_space<vmem>>, vector<1x1x4x256xf32>,
    %c255_i32_22 = arith.constant 255 : i32
    %56 = tpu.dynamic_rotate %51 by %c255_i32_22 dim 1 : vector<4x256xf32>, i32 -> vector<4x256xf32>
    %c1_i32_23 = arith.constant 1 : i32
    %57 = tpu.dynamic_rotate %51 by %c1_i32_23 dim 1 : vector<4x256xf32>, i32 -> vector<4x256xf32>
    %cst_24 = arith.constant 0xFF800000 : f32
    %58 = vector.broadcast %cst_24 : f32 to vector<4x256xf32>
    %59 = arith.select %7, %56, %58 : vector<4x256xi1>, vector<4x256xf32>
    %60 = arith.maximumf %51, %59 : vector<4x256xf32>
    %cst_25 = arith.constant 0xFF800000 : f32
    %61 = vector.broadcast %cst_25 : f32 to vector<4x256xf32>
    %62 = arith.select %5, %57, %61 : vector<4x256xi1>, vector<4x256xf32>
    %63 = arith.maximumf %60, %62 : vector<4x256xf32>
    %c255_i32_26 = arith.constant 255 : i32
    %64 = tpu.dynamic_rotate %63 by %c255_i32_26 dim 1 : vector<4x256xf32>, i32 -> vector<4x256xf32>
    %c1_i32_27 = arith.constant 1 : i32
    %65 = tpu.dynamic_rotate %63 by %c1_i32_27 dim 1 : vector<4x256xf32>, i32 -> vector<4x256xf32>
    %cst_28 = arith.constant 0xFF800000 : f32
    %66 = vector.broadcast %cst_28 : f32 to vector<4x256xf32>
    %67 = arith.select %7, %64, %66 : vector<4x256xi1>, vector<4x256xf32>
    %68 = arith.maximumf %63, %67 : vector<4x256xf32>
    %cst_29 = arith.constant 0xFF800000 : f32
    %69 = vector.broadcast %cst_29 : f32 to vector<4x256xf32>
    %70 = arith.select %5, %65, %69 : vector<4x256xi1>, vector<4x256xf32>
    %71 = arith.maximumf %68, %70 : vector<4x256xf32>
    %c240_i32_30 = arith.constant 240 : i32
    %72 = tpu.dynamic_rotate %71 by %c240_i32_30 dim 1 : vector<4x256xf32>, i32 -> vector<4x256xf32>
    %c16_i32_31 = arith.constant 16 : i32
    %73 = tpu.dynamic_rotate %71 by %c16_i32_31 dim 1 : vector<4x256xf32>, i32 -> vector<4x256xf32>
    %cst_32 = arith.constant 0xFF800000 : f32
    %74 = vector.broadcast %cst_32 : f32 to vector<4x256xf32>
    %75 = arith.select %11, %72, %74 : vector<4x256xi1>, vector<4x256xf32>
    %76 = arith.maximumf %71, %75 : vector<4x256xf32>
    %cst_33 = arith.constant 0xFF800000 : f32
    %77 = vector.broadcast %cst_33 : f32 to vector<4x256xf32>
    %78 = arith.select %9, %73, %77 : vector<4x256xi1>, vector<4x256xf32>
    %79 = arith.maximumf %76, %78 : vector<4x256xf32>
    %c240_i32_34 = arith.constant 240 : i32
    %80 = tpu.dynamic_rotate %79 by %c240_i32_34 dim 1 : vector<4x256xf32>, i32 -> vector<4x256xf32>
    %c16_i32_35 = arith.constant 16 : i32
    %81 = tpu.dynamic_rotate %79 by %c16_i32_35 dim 1 : vector<4x256xf32>, i32 -> vector<4x256xf32>
    %cst_36 = arith.constant 0xFF800000 : f32
    %82 = vector.broadcast %cst_36 : f32 to vector<4x256xf32>
    %83 = arith.select %11, %80, %82 : vector<4x256xi1>, vector<4x256xf32>
    %84 = arith.maximumf %79, %83 : vector<4x256xf32>
    %cst_37 = arith.constant 0xFF800000 : f32
    %85 = vector.broadcast %cst_37 : f32 to vector<4x256xf32>
    %86 = arith.select %9, %81, %85 : vector<4x256xi1>, vector<4x256xf32>
    %87 = arith.maximumf %84, %86 : vector<4x256xf32>
    %c0_38 = arith.constant 0 : index
    %c2 = arith.constant 2 : index
    %88 = arith.index_cast %12 : i32 to index
    %c0_39 = arith.constant 0 : index
    %89 = vector.load %arg4[%c0_38, %c2, %88, %c0_39] : memref<1x4x4x256xf32, #tpu.memory_space<vmem>>, vector<1x1x4x256xf32>
    %90 = vector.shape_cast %89 : vector<1x1x4x256xf32> to vector<4x256xf32>
    %91 = vector.shape_cast %87 : vector<4x256xf32> to vector<1x1x4x256xf32>
    tpu.vector_store %arg4[%c0_38, %c2, %88, %c0_39], %91 {strides = array<i32>} : memref<1x4x4x256xf32, #tpu.memory_space<vmem>>, vector<1x1x4x256xf32>,
    %c255_i32_40 = arith.constant 255 : i32
    %92 = tpu.dynamic_rotate %87 by %c255_i32_40 dim 1 : vector<4x256xf32>, i32 -> vector<4x256xf32>
    %c1_i32_41 = arith.constant 1 : i32
    %93 = tpu.dynamic_rotate %87 by %c1_i32_41 dim 1 : vector<4x256xf32>, i32 -> vector<4x256xf32>
    %cst_42 = arith.constant 0xFF800000 : f32
    %94 = vector.broadcast %cst_42 : f32 to vector<4x256xf32>
    %95 = arith.select %7, %92, %94 : vector<4x256xi1>, vector<4x256xf32>
    %96 = arith.maximumf %87, %95 : vector<4x256xf32>
    %cst_43 = arith.constant 0xFF800000 : f32
    %97 = vector.broadcast %cst_43 : f32 to vector<4x256xf32>
    %98 = arith.select %5, %93, %97 : vector<4x256xi1>, vector<4x256xf32>
    %99 = arith.maximumf %96, %98 : vector<4x256xf32>
    %c255_i32_44 = arith.constant 255 : i32
    %100 = tpu.dynamic_rotate %99 by %c255_i32_44 dim 1 : vector<4x256xf32>, i32 -> vector<4x256xf32>
    %c1_i32_45 = arith.constant 1 : i32
    %101 = tpu.dynamic_rotate %99 by %c1_i32_45 dim 1 : vector<4x256xf32>, i32 -> vector<4x256xf32>
    %cst_46 = arith.constant 0xFF800000 : f32
    %102 = vector.broadcast %cst_46 : f32 to vector<4x256xf32>
    %103 = arith.select %7, %100, %102 : vector<4x256xi1>, vector<4x256xf32>
    %104 = arith.maximumf %99, %103 : vector<4x256xf32>
    %cst_47 = arith.constant 0xFF800000 : f32
    %105 = vector.broadcast %cst_47 : f32 to vector<4x256xf32>
    %106 = arith.select %5, %101, %105 : vector<4x256xi1>, vector<4x256xf32>
    %107 = arith.maximumf %104, %106 : vector<4x256xf32>
    %c240_i32_48 = arith.constant 240 : i32
    %108 = tpu.dynamic_rotate %107 by %c240_i32_48 dim 1 : vector<4x256xf32>, i32 -> vector<4x256xf32>
    %c16_i32_49 = arith.constant 16 : i32
    %109 = tpu.dynamic_rotate %107 by %c16_i32_49 dim 1 : vector<4x256xf32>, i32 -> vector<4x256xf32>
    %cst_50 = arith.constant 0xFF800000 : f32
    %110 = vector.broadcast %cst_50 : f32 to vector<4x256xf32>
    %111 = arith.select %11, %108, %110 : vector<4x256xi1>, vector<4x256xf32>
    %112 = arith.maximumf %107, %111 : vector<4x256xf32>
    %cst_51 = arith.constant 0xFF800000 : f32
    %113 = vector.broadcast %cst_51 : f32 to vector<4x256xf32>
    %114 = arith.select %9, %109, %113 : vector<4x256xi1>, vector<4x256xf32>
    %115 = arith.maximumf %112, %114 : vector<4x256xf32>
    %c240_i32_52 = arith.constant 240 : i32
    %116 = tpu.dynamic_rotate %115 by %c240_i32_52 dim 1 : vector<4x256xf32>, i32 -> vector<4x256xf32>
    %c16_i32_53 = arith.constant 16 : i32
    %117 = tpu.dynamic_rotate %115 by %c16_i32_53 dim 1 : vector<4x256xf32>, i32 -> vector<4x256xf32>
    %cst_54 = arith.constant 0xFF800000 : f32
    %118 = vector.broadcast %cst_54 : f32 to vector<4x256xf32>
    %119 = arith.select %11, %116, %118 : vector<4x256xi1>, vector<4x256xf32>
    %120 = arith.maximumf %115, %119 : vector<4x256xf32>
    %cst_55 = arith.constant 0xFF800000 : f32
    %121 = vector.broadcast %cst_55 : f32 to vector<4x256xf32>
    %122 = arith.select %9, %117, %121 : vector<4x256xi1>, vector<4x256xf32>
    %123 = arith.maximumf %120, %122 : vector<4x256xf32>
    %c0_56 = arith.constant 0 : index
    %c3 = arith.constant 3 : index
    %124 = arith.index_cast %12 : i32 to index
    %c0_57 = arith.constant 0 : index
    %125 = vector.load %arg4[%c0_56, %c3, %124, %c0_57] : memref<1x4x4x256xf32, #tpu.memory_space<vmem>>, vector<1x1x4x256xf32>
    %126 = vector.shape_cast %125 : vector<1x1x4x256xf32> to vector<4x256xf32>
    %127 = vector.shape_cast %123 : vector<4x256xf32> to vector<1x1x4x256xf32>
    tpu.vector_store %arg4[%c0_56, %c3, %124, %c0_57], %127 {strides = array<i32>} : memref<1x4x4x256xf32, #tpu.memory_space<vmem>>, vector<1x1x4x256xf32>,
    %c1_i32_58 = arith.constant 1 : i32
    return
  }
  func.func @transform_0(%arg0: i32, %arg1: i32) -> (i32, i32) {
    %c0_i32 = arith.constant 0 : i32
    %c0_i32_0 = arith.constant 0 : i32
    %c0_i32_1 = arith.constant 0 : i32
    return %c0_i32, %c0_i32_0 : i32, i32
  }
  func.func @transform_1(%arg0: i32, %arg1: i32) -> (i32, i32, i32) {
    %c0_i32 = arith.constant 0 : i32
    %c0_i32_0 = arith.constant 0 : i32
    return %arg0, %arg1, %c0_i32 : i32, i32, i32
  }
  func.func @transform_2(%arg0: i32, %arg1: i32) -> (i32, i32, i32, i32) {
    %c0_i32 = arith.constant 0 : i32
    %c0_i32_0 = arith.constant 0 : i32
    %c0_i32_1 = arith.constant 0 : i32
    return %arg0, %c0_i32, %arg1, %c0_i32_0 : i32, i32, i32, i32
  }
}

</mosaic_0001>

<bundles_post_ra>
// kernel: tpu_custom_call.1
= control target key start
LH: loop header
LB: loop body
LE: loop exit
PB: predicated region body
PF: predicated region fallthrough
CT: control target
= control target key end

     0   :  { %7 = vsyncpa [#allocation3], 0  ;;  %s1508_s0 = inlined_call_operand.hbm [shape: s32[1,256], index: 0, kind: input, shape index: {}]   ;;  %s1509_s1 = inlined_call_operand.hbm [shape: f32[2,4,256], index: 1, kind: input, shape index: {}]   ;;  %s1510_s2 = inlined_call_operand.hbm [shape: f32[2,4,4,256], index: 2, kind: output, shape index: {}]  }
   0x1   :  { %8 = vsyncpa [#allocation6], 0 }
   0x2   :  { %10 = vsyncpa [#allocation6 + $0x1], 0 }
   0x3   :  { %11 = vsyncpa [#allocation4], 0 }
   0x4   :  { %13 = vsyncpa [#allocation4 + $0x1], 0  ;;  %s1078_s9 = smov 0   ;;  %s1080_s10 = smov 0  }
   0x5   :  { %s1082_s11 = smov 0   ;;  %s1084_s12 = smov 0  }
   0x6   :  { %s1086_s13 = smov 0   ;;  %s1088_s14 = smov 0  }
   0x7 LB: > { %s807_s15 = sadd.s32 4294967295, %s1054_s14   ;;  %s808_s16 = sadd.s32 4294967294, %s1054_s14   ;;  %s1054_s14 = sphi %s1088_s14, %s19_s14   ;;  %s1050_s13 = sphi %s1086_s13, %s1530_s13   ;;  %s1046_s12 = sphi %s1084_s12, %s1529_s12   ;;  %s1042_s11 = sphi %s1082_s11, %s1528_s11   ;;  %s1038_s10 = sphi %s1080_s10, %s1527_s10   ;;  %s1034_s9 = sphi %s1078_s9, %s1526_s9  }
   0x8   : > { %p74_p0 = scmp.ne.s32.totalorder %s1038_s10, %s1034_s9  ;;  %p1112_p1 = scmp.eq.s32.totalorder %s807_s15, 0 }
   0x9   : > { %p1116_p2 = scmp.eq.s32.totalorder %s807_s15, 1  ;;  %p106_p3 = scmp.eq.s32.totalorder %s808_s16, 1 }
   0xa   : > { %p1122_p4 = por %p1112_p1, %p74_p0  ;;  %p809_p5 = scmp.ge.s32.totalorder %s1054_s14, 1 }
   0xb   : > { %p1127_p6 = por %p106_p3, %p74_p0  ;;  %p113_p7 = scmp.lt.s32.totalorder %s1054_s14, 3 }
   0xc   : > { %s125_s23 = sshll.u32 %s1508_s0, 4  ;;  %p811_p9 = scmp.ge.s32.totalorder %s1054_s14, 2  ;;  %s126_s23 = int_to_ptr.hbm [resolvable:$true] %s125_s23 }
   0xd   : > { %p1135_p8 = pnand %p809_p5, %p113_p7  ;;  %s1056_s25 = smov [#allocation2]  }
   0xe   : > { %s127_s26 = sshll.u32 %s1056_s25, 4  ;;  %s31_s27 = sadd.s32 1, %s1050_s13  ;;  %s128_s26 = int_to_ptr.vmem [resolvable:$true] %s127_s26 }
   0xf   : > { %p837_p10 = pneg %p1135_p8  ;;  %p33_p12 = scmp.ge.s32.totalorder %s31_s27, 2 }
  0x10   : > { %s61_s28 = sadd.s32 1, %s1042_s11  ;;  %p68_p13 = scmp.ne.s32.totalorder %s1042_s11, %s1038_s10 }
  0x11   : > { %p838_p11 = pnand %p837_p10, %p1112_p1  ;;  %p69_p0 = scmp.eq.s32.totalorder %s1054_s14, 0 }
  0x12   : > { %s1532_s27 = smov (%p33_p12, %s31_s27), 0  ;;  %p1157_p5 = por %p1116_p2, %p68_p13 }
  0x13   : > { %840 = dma.hbm_to_vmem [thread:$0]  (!%p838_p11), %s126_s23, 32, %s128_s26, [#allocation3]  }
  0x14   : > { %p1151_p3 = por %p69_p0, %p68_p13  ;;  %s56_s3 = ssub.s32 %s1050_s13, %s1532_s27 }
  0x15   : > { %p850_p7 = scmp.lt.s32.totalorder %s1054_s14, 2  ;;  %p59_p10 = scmp.eq.s32.totalorder %s56_s3, 0 }
  0x16   : > { %s138_s4 = sand.u32 1, %s1042_s11   ;;  %s827_s7 = sshll.u32 %s1050_s13, 3 }
  0x17   : > { %s812_s5 = sshll.u32 %s138_s4, 3  ;;  %s149_s16 = scalar_lea.hbm %s1509_s1, %s827_s7 }
  0x18   : > { %s1166_s6 = scalar_select %p59_p10, %s1042_s11, %s61_s28  }
  0x19   : > { %s142_s21 = scalar_lea.vmem [#allocation5], %s812_s5  ;;  %s151_s18 = sshll.u32 %s149_s16, 4  ;;  %s152_s18 = int_to_ptr.hbm [resolvable:$true] %s151_s18 }
  0x1a   : > { %s153_s22 = sshll.u32 %s142_s21, 4  ;;  %p842_p2 = pnand %p850_p7, %p1151_p3  ;;  %s154_s22 = int_to_ptr.vmem [resolvable:$true] %s153_s22 }
  0x1b   : > { %s139_s23 = scalar_lea.sflag [#allocation6], %s138_s4  ;;  %162 = sbr.rel (%p1135_p8) target bundleno = 1703 (0x6a7), region = 28 }
  0x1c   : > { %844 = dma.hbm_to_vmem [thread:$0]  (!%p842_p2), %s152_s18, 128, %s154_s22, %s139_s23  }
  0x20   : > { %1021 = dma.done.wait (%p1112_p1), [#allocation3], 32  }
  0x21   : > { %1023 = vsyncadd (%p1112_p1), [#allocation3], 4294967264  ;;  %s1181_s25 = sand.u32 1, %s1038_s10  }
  0x22   : > { %s817_s26 = sshll.u32 %s1181_s25, 3  ;;  %s170_s28 = scalar_lea.sflag [#allocation6], %s1181_s25 }
  0x23   : > { %s173_s29 = scalar_lea.vmem [#allocation5], %s817_s26 }
  0x24   : > { %1025 = dma.done.wait (%p1122_p4), %s170_s28, 128  }
  0x25   : > { %1027 = vsyncadd (%p1122_p4), %s170_s28, 4294967168  ;;  %v1189_v0 = vld [vmem:[%s173_s29] sm:$0xff]  ;;  %s1057_s17 = smov 127   ;;  %s1058_s24 = smov 1   ;;  %v195_v5 = vlaneseq  ;;  %v198_v7 = vld [vmem:[#allocation2] sm:$0x3] }
  0x26   : > { %212 = vst [vmem:[#allocation1] ss:$2 sm:$0xff] %v1189_v0  ;;  %v200_v9 = vperm.slane %v198_v7, 1  ;;  %v199_v13 = vperm.slane %v198_v7, 0  ;;  %vm241_vm3 = vcmask 1043456   ;;  %s1059_s19 = smov 112  }
  0x27   : > { %v1197_v8 = vand.u32 127, %v195_v5  ;;  %s1060_s3 = smov 16   ;;  %s818_s4 = sshll.u32 %s1181_s25, 5 }
  0x28   : > { %vm1200_vm1 = vcmp.lt.s32.totalorder %v200_v9, 15  ;;  %vm1208_vm2 = vcmp.lt.s32.totalorder %v199_v13, 15  ;;  %vm1215_vm5 = vcmp.ge.s32.totalorder %v200_v9, 1  ;;  %vm1222_vm6 = vcmp.ge.s32.totalorder %v199_v13, 1  ;;  %s1284_s5 = scalar_lea.vmem [#allocation7], %s818_s4  ;;  %s828_s7 = sshll.u32 %s1046_s12, 5 }
  0x29   : > { %vm221_vm0 = vcmp.lt.s32.totalorder %v1197_v8, 127  ;;  %vm233_vm4 = vcmp.lt.s32.totalorder %v1197_v8, 1  ;;  %v1263_v58 = vadd.s32 128, %v1197_v8  ;;  %vm302_vm7 = vcmp.lt.s32.totalorder %v1197_v8, 112  ;;  %210 = vst [vmem:[%s1284_s5] sm:$0xff] %v1189_v0  ;;  %s704_s16 = scalar_lea.hbm %s1510_s2, %s828_s7  ;;  %s705_s12 = sshll.u32 %s1284_s5, 4  ;;  %s706_s12 = int_to_ptr.vmem [resolvable:$true] %s705_s12 }
  0x2a   : > { %vm314_vm9 = vcmp.lt.s32.totalorder %v1197_v8, 16  ;;  %vm205_vm10 = vcmp.ge.s32.totalorder %v1197_v8, 16  ;;  %s707_s21 = sshll.u32 %s704_s16, 4  ;;  %s691_s22 = scalar_lea.sflag [#allocation4], %s1181_s25  ;;  %s708_s21 = int_to_ptr.hbm [resolvable:$true] %s707_s21 }
  0x2b   : > { %vm208_vm8 = vcmp.lt.s32.totalorder %v1263_v58, 240  ;;  %s982_s18 = sshra.s32 %s708_s21, 4  ;;  %s988_s29 = scalar_lea.hbm %s1510_s2, 64  ;;  %s983_s18 = int_to_ptr.hbm [resolvable:$true] %s982_s18 }
  0x2c   : > { %s984_s23 = scalar_lea.hbm %s983_s18, 32  ;;  %p989_p11 = scmp.lt.s32.totalorder %s983_s18, %s1510_s2 }
  0x2d   : > { %v213_v1 = vld.sshfl [vmem:[#allocation1] sm:$0xff pattern:$0x75316420]  ;;  %v214_v2 = vld.sshfl [vmem:[#allocation1 + $0x8] sm:$0xff pattern:$0x75316420]  ;;  %p985_p1 = scmp.ne.s32.totalorder %s983_s18, %s984_s23  ;;  %p990_p12 = scmp.lt.s32.totalorder %s988_s29, %s984_s23 }
  0x2e   : > { %217 = vrot.lane.b32.xlu0 %v213_v1, %s1057_s17  ;;  %224 = vst [vmem:[#allocation1] ss:$2 sm:$0xff] %v1189_v0 }
  0x2f   : > { %p986_p4 = pnand %p985_p1, %p1157_p5  ;;  %p991_p13 = por %p990_p12, %p989_p11 }
  0x31   : > { %p987_p8 = pneg %p986_p4 }
  0x33   : > { %p992_p0 = pnand %p991_p13, %p987_p8 }
  0x35   : > { %v225_v3 = vld.sshfl [vmem:[#allocation1] sm:$0xff pattern:$0x75316420]  ;;  %v226_v4 = vld.sshfl [vmem:[#allocation1 + $0x8] sm:$0xff pattern:$0x75316420] }
  0x36   : > { %219 = vrot.lane.b32.xlu0 %v214_v2, %s1057_s17  ;;  %229 = vrot.lane.b32.xlu1 %v225_v3, %s1058_s24 }
  0x3e   : > { %231 = vrot.lane.b32.xlu1 %v226_v4, %s1058_s24 }
  0xa0   : > { %v218_v6 = vpop.permute.xlu0 %217 }
  0xa8   : > { %v220_v11 = vpop.permute.xlu0 %219  ;;  %v230_v12 = vpop.permute.xlu1 %229 }
  0xa9   : > { %v223_v14 = vsel %vm221_vm0, %v220_v11, %v218_v6  ;;  %v222_v17 = vsel %vm221_vm0, %v218_v6, %v220_v11 }
  0xaa   : > { %v237_v15 = vsel %vm1200_vm1, %v223_v14, -inf  ;;  %v236_v20 = vsel %vm1208_vm2, %v222_v17, -inf }
  0xab   : > { %v240_v18 = vrot.slane %v237_v15, 4 }
  0xad   : > { %v242_v22 = vsel %vm241_vm3, %v236_v20, %v240_v18 }
  0xae   : > { %v244_v28 = vmax.f32 %v1189_v0, %v242_v22 }
  0xb0   : > { %v232_v21 = vpop.permute.xlu1 %231 }
  0xb1   : > { %v234_v24 = vsel %vm233_vm4, %v230_v12, %v232_v21  ;;  %v235_v25 = vsel %vm233_vm4, %v232_v21, %v230_v12 }
  0xb2   : > { %v246_v26 = vsel %vm1215_vm5, %v234_v24, -inf  ;;  %v245_v29 = vsel %vm1222_vm6, %v235_v25, -inf }
  0xb3   : > { %v249_v27 = vrot.slane %v246_v26, 4 }
  0xb5   : > { %v250_v30 = vsel %vm241_vm3, %v245_v29, %v249_v27 }
  0xb6   : > { %v252_v31 = vmax.f32 %v244_v28, %v250_v30 }
  0xb8   : > { %254 = vst [vmem:[#allocation1] ss:$2 sm:$0xff] %v252_v31 }
  0xbf   : > { %v255_v32 = vld.sshfl [vmem:[#allocation1] sm:$0xff pattern:$0x75316420]  ;;  %v256_v33 = vld.sshfl [vmem:[#allocation1 + $0x8] sm:$0xff pattern:$0x75316420] }
  0xc0   : > { %265 = vst [vmem:[#allocation1] ss:$2 sm:$0xff] %v252_v31  ;;  %259 = vrot.lane.b32.xlu2 %v255_v32, %s1057_s17 }
  0xc7   : > { %v266_v34 = vld.sshfl [vmem:[#allocation1] sm:$0xff pattern:$0x75316420]  ;;  %v267_v35 = vld.sshfl [vmem:[#allocation1 + $0x8] sm:$0xff pattern:$0x75316420] }
  0xc8   : > { %261 = vrot.lane.b32.xlu2 %v256_v33, %s1057_s17  ;;  %272 = vrot.lane.b32.xlu1 %v267_v35, %s1058_s24 }
  0xc9   : > { %270 = vrot.lane.b32.xlu0 %v266_v34, %s1058_s24 }
 0x11a   : > { %v260_v36 = vpop.permute.xlu2 %259 }
 0x122   : > { %v262_v37 = vpop.permute.xlu2 %261 }
 0x123   : > { %v264_v38 = vsel %vm221_vm0, %v262_v37, %v260_v36  ;;  %v263_v40 = vsel %vm221_vm0, %v260_v36, %v262_v37 }
 0x124   : > { %v277_v39 = vsel %vm1200_vm1, %v264_v38, -inf  ;;  %v276_v43 = vsel %vm1208_vm2, %v263_v40, -inf }
 0x125   : > { %v280_v41 = vrot.slane %v277_v39, 4 }
 0x127   : > { %v281_v45 = vsel %vm241_vm3, %v276_v43, %v280_v41 }
 0x128   : > { %v283_v50 = vmax.f32 %v252_v31, %v281_v45 }
 0x13a   : > { %v273_v42 = vpop.permute.xlu1 %272 }
 0x13b   : > { %v271_v44 = vpop.permute.xlu0 %270 }
 0x13c   : > { %v274_v46 = vsel %vm233_vm4, %v271_v44, %v273_v42  ;;  %v275_v47 = vsel %vm233_vm4, %v273_v42, %v271_v44 }
 0x13d   : > { %v285_v48 = vsel %vm1215_vm5, %v274_v46, -inf  ;;  %v284_v51 = vsel %vm1222_vm6, %v275_v47, -inf }
 0x13e   : > { %v288_v49 = vrot.slane %v285_v48, 4 }
 0x140   : > { %v289_v52 = vsel %vm241_vm3, %v284_v51, %v288_v49 }
 0x141   : > { %v291_v53 = vmax.f32 %v283_v50, %v289_v52 }
 0x143   : > { %293 = vst [vmem:[#allocation1] ss:$2 sm:$0xff] %v291_v53 }
 0x14a   : > { %v294_v54 = vld.sshfl [vmem:[#allocation1] sm:$0xff pattern:$0x75316420]  ;;  %v295_v55 = vld.sshfl [vmem:[#allocation1 + $0x8] sm:$0xff pattern:$0x75316420] }
 0x14b   : > { %305 = vst [vmem:[#allocation1] ss:$2 sm:$0xff] %v291_v53  ;;  %300 = vrot.lane.b32.xlu0 %v295_v55, %s1059_s19  ;;  %298 = vrot.lane.b32.xlu2 %v294_v54, %s1059_s19 }
 0x152   : > { %v307_v56 = vld.sshfl [vmem:[#allocation1 + $0x8] sm:$0xff pattern:$0x75316420]  ;;  %v306_v57 = vld.sshfl [vmem:[#allocation1] sm:$0xff pattern:$0x75316420] }
 0x153   : > { %312 = vrot.lane.b32.xlu2 %v307_v56, %s1060_s3  ;;  %310 = vrot.lane.b32.xlu1 %v306_v57, %s1060_s3 }
 0x1a5   : > { %v299_v59 = vpop.permute.xlu2 %298 }
 0x1ad   : > { %v313_v2 = vpop.permute.xlu2 %312 }
 0x1bd   : > { %v301_v60 = vpop.permute.xlu0 %300 }
 0x1be   : > { %v304_v61 = vsel %vm302_vm7, %v301_v60, %v299_v59  ;;  %v303_v1 = vsel %vm302_vm7, %v299_v59, %v301_v60 }
 0x1bf   : > { %v318_v62 = vsel %vm208_vm8, %v304_v61, -inf }
 0x1c0   : > { %v321_v63 = vrot.slane %v318_v62, 4 }
 0x1c2   : > { %v322_v3 = vsel %vm241_vm3, %v303_v1, %v321_v63 }
 0x1c3   : > { %v324_v11 = vmax.f32 %v291_v53, %v322_v3 }
 0x1c5   : > { %v311_v4 = vpop.permute.xlu1 %310 }
 0x1c6   : > { %v315_v5 = vsel %vm314_vm9, %v311_v4, %v313_v2  ;;  %v316_v6 = vsel %vm314_vm9, %v313_v2, %v311_v4 }
 0x1c7   : > { %v325_v7 = vsel %vm205_vm10, %v316_v6, -inf  ;;  %v329_v9 = vrot.slane %v315_v5, 4 }
 0x1c9   : > { %v330_v12 = vsel %vm241_vm3, %v325_v7, %v329_v9 }
 0x1ca   : > { %v332_v13 = vmax.f32 %v324_v11, %v330_v12 }
 0x1cc   : > { %334 = vst [vmem:[#allocation1] ss:$2 sm:$0xff] %v332_v13 }
 0x1d3   : > { %v336_v14 = vld.sshfl [vmem:[#allocation1 + $0x8] sm:$0xff pattern:$0x75316420]  ;;  %v335_v15 = vld.sshfl [vmem:[#allocation1] sm:$0xff pattern:$0x75316420] }
 0x1d4   : > { %341 = vrot.lane.b32.xlu1 %v336_v14, %s1059_s19  ;;  %339 = vrot.lane.b32.xlu0 %v335_v15, %s1059_s19  ;;  %345 = vst [vmem:[#allocation1] ss:$2 sm:$0xff] %v332_v13 }
 0x1db   : > { %v347_v17 = vld.sshfl [vmem:[#allocation1 + $0x8] sm:$0xff pattern:$0x75316420]  ;;  %v346_v18 = vld.sshfl [vmem:[#allocation1] sm:$0xff pattern:$0x75316420] }
 0x1dc   : > { %352 = vrot.lane.b32.xlu0 %v347_v17, %s1060_s3  ;;  %350 = vrot.lane.b32.xlu2 %v346_v18, %s1060_s3 }
 0x236   : > { %v351_v26 = vpop.permute.xlu2 %350 }
 0x246   : > { %v342_v20 = vpop.permute.xlu1 %341  ;;  %v340_v21 = vpop.permute.xlu0 %339 }
 0x247   : > { %v344_v22 = vsel %vm302_vm7, %v342_v20, %v340_v21  ;;  %v343_v25 = vsel %vm302_vm7, %v340_v21, %v342_v20 }
 0x248   : > { %v357_v0 = vsel %vm208_vm8, %v344_v22, -inf }
 0x249   : > { %v360_v24 = vrot.slane %v357_v0, 4 }
 0x24b   : > { %v361_v27 = vsel %vm241_vm3, %v343_v25, %v360_v24 }
 0x24c   : > { %v363_v33 = vmax.f32 %v332_v13, %v361_v27 }
 0x24e   : > { %v353_v28 = vpop.permute.xlu0 %352 }
 0x24f   : > { %v354_v29 = vsel %vm314_vm9, %v351_v26, %v353_v28  ;;  %v355_v30 = vsel %vm314_vm9, %v353_v28, %v351_v26 }
 0x250   : > { %v364_v31 = vsel %vm205_vm10, %v355_v30, -inf  ;;  %v368_v32 = vrot.slane %v354_v29, 4 }
 0x252   : > { %v369_v34 = vsel %vm241_vm3, %v364_v31, %v368_v32 }
 0x253   : > { %v371_v35 = vmax.f32 %v363_v33, %v369_v34 }
 0x255   : > { %819 = vst [vmem:[%s1284_s5 + $0x8] sm:$0xff] %v371_v35 }
 0x256   : > { %375 = vst [vmem:[#allocation1] ss:$2 sm:$0xff] %v371_v35 }
 0x25d   : > { %v377_v36 = vld.sshfl [vmem:[#allocation1 + $0x8] sm:$0xff pattern:$0x75316420]  ;;  %v376_v37 = vld.sshfl [vmem:[#allocation1] sm:$0xff pattern:$0x75316420] }
 0x25e   : > { %382 = vrot.lane.b32.xlu2 %v377_v36, %s1057_s17  ;;  %380 = vrot.lane.b32.xlu1 %v376_v37, %s1057_s17  ;;  %386 = vst [vmem:[#allocation1] ss:$2 sm:$0xff] %v371_v35 }
 0x265   : > { %v388_v38 = vld.sshfl [vmem:[#allocation1 + $0x8] sm:$0xff pattern:$0x75316420]  ;;  %v387_v39 = vld.sshfl [vmem:[#allocation1] sm:$0xff pattern:$0x75316420] }
 0x266   : > { %393 = vrot.lane.b32.xlu1 %v388_v38, %s1058_s24  ;;  %391 = vrot.lane.b32.xlu0 %v387_v39, %s1058_s24 }
 0x2b8   : > { %v383_v40 = vpop.permute.xlu2 %382 }
 0x2d0   : > { %v381_v41 = vpop.permute.xlu1 %380 }
 0x2d1   : > { %v385_v42 = vsel %vm221_vm0, %v383_v40, %v381_v41  ;;  %v384_v44 = vsel %vm221_vm0, %v381_v41, %v383_v40 }
 0x2d2   : > { %v398_v43 = vsel %vm1200_vm1, %v385_v42, -inf  ;;  %v397_v46 = vsel %vm1208_vm2, %v384_v44, -inf }
 0x2d3   : > { %v401_v45 = vrot.slane %v398_v43, 4 }
 0x2d5   : > { %v402_v49 = vsel %vm241_vm3, %v397_v46, %v401_v45 }
 0x2d6   : > { %v404_v54 = vmax.f32 %v371_v35, %v402_v49 }
 0x2d8   : > { %v394_v47 = vpop.permute.xlu1 %393  ;;  %v392_v48 = vpop.permute.xlu0 %391 }
 0x2d9   : > { %v395_v50 = vsel %vm233_vm4, %v392_v48, %v394_v47  ;;  %v396_v51 = vsel %vm233_vm4, %v394_v47, %v392_v48 }
 0x2da   : > { %v406_v52 = vsel %vm1215_vm5, %v395_v50, -inf  ;;  %v405_v55 = vsel %vm1222_vm6, %v396_v51, -inf }
 0x2db   : > { %v409_v53 = vrot.slane %v406_v52, 4 }
 0x2dd   : > { %v410_v56 = vsel %vm241_vm3, %v405_v55, %v409_v53 }
 0x2de   : > { %v412_v57 = vmax.f32 %v404_v54, %v410_v56 }
 0x2e0   : > { %414 = vst [vmem:[#allocation1] ss:$2 sm:$0xff] %v412_v57 }
 0x2e7   : > { %v416_v59 = vld.sshfl [vmem:[#allocation1 + $0x8] sm:$0xff pattern:$0x75316420]  ;;  %v415_v60 = vld.sshfl [vmem:[#allocation1] sm:$0xff pattern:$0x75316420] }
 0x2e8   : > { %421 = vrot.lane.b32.xlu0 %v416_v59, %s1057_s17  ;;  %419 = vrot.lane.b32.xlu2 %v415_v60, %s1057_s17  ;;  %425 = vst [vmem:[#allocation1] ss:$2 sm:$0xff] %v412_v57 }
 0x2ef   : > { %v427_v61 = vld.sshfl [vmem:[#allocation1 + $0x8] sm:$0xff pattern:$0x75316420]  ;;  %v426_v62 = vld.sshfl [vmem:[#allocation1] sm:$0xff pattern:$0x75316420] }
 0x2f0   : > { %432 = vrot.lane.b32.xlu2 %v427_v61, %s1058_s24  ;;  %430 = vrot.lane.b32.xlu1 %v426_v62, %s1058_s24 }
 0x342   : > { %v420_v63 = vpop.permute.xlu2 %419 }
 0x34a   : > { %v433_v6 = vpop.permute.xlu2 %432 }
 0x35a   : > { %v422_v1 = vpop.permute.xlu0 %421 }
 0x35b   : > { %v424_v2 = vsel %vm221_vm0, %v422_v1, %v420_v63  ;;  %v423_v4 = vsel %vm221_vm0, %v420_v63, %v422_v1 }
 0x35c   : > { %v437_v3 = vsel %vm1200_vm1, %v424_v2, -inf  ;;  %v436_v7 = vsel %vm1208_vm2, %v423_v4, -inf }
 0x35d   : > { %v440_v5 = vrot.slane %v437_v3, 4 }
 0x35f   : > { %v441_v11 = vsel %vm241_vm3, %v436_v7, %v440_v5 }
 0x360   : > { %v443_v17 = vmax.f32 %v412_v57, %v441_v11 }
 0x362   : > { %v431_v9 = vpop.permute.xlu1 %430 }
 0x363   : > { %v434_v12 = vsel %vm233_vm4, %v431_v9, %v433_v6  ;;  %v435_v13 = vsel %vm233_vm4, %v433_v6, %v431_v9 }
 0x364   : > { %v445_v14 = vsel %vm1215_vm5, %v434_v12, -inf  ;;  %v444_v18 = vsel %vm1222_vm6, %v435_v13, -inf }
 0x365   : > { %v448_v15 = vrot.slane %v445_v14, 4 }
 0x367   : > { %v449_v20 = vsel %vm241_vm3, %v444_v18, %v448_v15 }
 0x368   : > { %v451_v21 = vmax.f32 %v443_v17, %v449_v20 }
 0x36a   : > { %453 = vst [vmem:[#allocation1] ss:$2 sm:$0xff] %v451_v21 }
 0x371   : > { %v455_v22 = vld.sshfl [vmem:[#allocation1 + $0x8] sm:$0xff pattern:$0x75316420]  ;;  %v454_v0 = vld.sshfl [vmem:[#allocation1] sm:$0xff pattern:$0x75316420] }
 0x372   : > { %460 = vrot.lane.b32.xlu1 %v455_v22, %s1059_s19  ;;  %458 = vrot.lane.b32.xlu0 %v454_v0, %s1059_s19  ;;  %464 = vst [vmem:[#allocation1] ss:$2 sm:$0xff] %v451_v21 }
 0x379   : > { %v466_v24 = vld.sshfl [vmem:[#allocation1 + $0x8] sm:$0xff pattern:$0x75316420]  ;;  %v465_v25 = vld.sshfl [vmem:[#allocation1] sm:$0xff pattern:$0x75316420] }
 0x37a   : > { %471 = vrot.lane.b32.xlu0 %v466_v24, %s1060_s3  ;;  %469 = vrot.lane.b32.xlu2 %v465_v25, %s1060_s3 }
 0x3d4   : > { %v470_v32 = vpop.permute.xlu2 %469 }
 0x3e4   : > { %v461_v26 = vpop.permute.xlu1 %460  ;;  %v459_v27 = vpop.permute.xlu0 %458 }
 0x3e5   : > { %v463_v28 = vsel %vm302_vm7, %v461_v26, %v459_v27  ;;  %v462_v31 = vsel %vm302_vm7, %v459_v27, %v461_v26 }
 0x3e6   : > { %v476_v29 = vsel %vm208_vm8, %v463_v28, -inf }
 0x3e7   : > { %v479_v30 = vrot.slane %v476_v29, 4 }
 0x3e9   : > { %v480_v33 = vsel %vm241_vm3, %v462_v31, %v479_v30 }
 0x3ea   : > { %v482_v39 = vmax.f32 %v451_v21, %v480_v33 }
 0x3ec   : > { %v472_v34 = vpop.permute.xlu0 %471 }
 0x3ed   : > { %v473_v35 = vsel %vm314_vm9, %v470_v32, %v472_v34  ;;  %v474_v36 = vsel %vm314_vm9, %v472_v34, %v470_v32 }
 0x3ee   : > { %v483_v37 = vsel %vm205_vm10, %v474_v36, -inf  ;;  %v487_v38 = vrot.slane %v473_v35, 4 }
 0x3f0   : > { %v488_v40 = vsel %vm241_vm3, %v483_v37, %v487_v38 }
 0x3f1   : > { %v490_v41 = vmax.f32 %v482_v39, %v488_v40 }
 0x3f3   : > { %492 = vst [vmem:[#allocation1] ss:$2 sm:$0xff] %v490_v41 }
 0x3fa   : > { %v494_v42 = vld.sshfl [vmem:[#allocation1 + $0x8] sm:$0xff pattern:$0x75316420]  ;;  %v493_v43 = vld.sshfl [vmem:[#allocation1] sm:$0xff pattern:$0x75316420] }
 0x3fb   : > { %499 = vrot.lane.b32.xlu2 %v494_v42, %s1059_s19  ;;  %497 = vrot.lane.b32.xlu1 %v493_v43, %s1059_s19  ;;  %503 = vst [vmem:[#allocation1] ss:$2 sm:$0xff] %v490_v41 }
 0x402   : > { %v505_v44 = vld.sshfl [vmem:[#allocation1 + $0x8] sm:$0xff pattern:$0x75316420]  ;;  %v504_v45 = vld.sshfl [vmem:[#allocation1] sm:$0xff pattern:$0x75316420] }
 0x403   : > { %510 = vrot.lane.b32.xlu1 %v505_v44, %s1060_s3  ;;  %508 = vrot.lane.b32.xlu0 %v504_v45, %s1060_s3 }
 0x455   : > { %v500_v46 = vpop.permute.xlu2 %499 }
 0x46d   : > { %v498_v47 = vpop.permute.xlu1 %497 }
 0x46e   : > { %v502_v48 = vsel %vm302_vm7, %v500_v46, %v498_v47  ;;  %v501_v51 = vsel %vm302_vm7, %v498_v47, %v500_v46 }
 0x46f   : > { %v515_v49 = vsel %vm208_vm8, %v502_v48, -inf }
 0x470   : > { %v518_v50 = vrot.slane %v515_v49, 4 }
 0x472   : > { %v519_v52 = vsel %vm241_vm3, %v501_v51, %v518_v50 }
 0x473   : > { %v521_v60 = vmax.f32 %v490_v41, %v519_v52 }
 0x475   : > { %v511_v53 = vpop.permute.xlu1 %510  ;;  %v509_v54 = vpop.permute.xlu0 %508 }
 0x476   : > { %v512_v55 = vsel %vm314_vm9, %v509_v54, %v511_v53  ;;  %v513_v56 = vsel %vm314_vm9, %v511_v53, %v509_v54 }
 0x477   : > { %v522_v57 = vsel %vm205_vm10, %v513_v56, -inf  ;;  %v526_v59 = vrot.slane %v512_v55, 4 }
 0x479   : > { %v527_v61 = vsel %vm241_vm3, %v522_v57, %v526_v59 }
 0x47a   : > { %v529_v62 = vmax.f32 %v521_v60, %v527_v61 }
 0x47c   : > { %820 = vst [vmem:[%s1284_s5 + $0x10] sm:$0xff] %v529_v62 }
 0x47d   : > { %533 = vst [vmem:[#allocation1] ss:$2 sm:$0xff] %v529_v62 }
 0x484   : > { %v535_v63 = vld.sshfl [vmem:[#allocation1 + $0x8] sm:$0xff pattern:$0x75316420]  ;;  %v534_v1 = vld.sshfl [vmem:[#allocation1] sm:$0xff pattern:$0x75316420] }
 0x485   : > { %540 = vrot.lane.b32.xlu0 %v535_v63, %s1057_s17  ;;  %538 = vrot.lane.b32.xlu2 %v534_v1, %s1057_s17  ;;  %544 = vst [vmem:[#allocation1] ss:$2 sm:$0xff] %v529_v62 }
 0x48c   : > { %v546_v2 = vld.sshfl [vmem:[#allocation1 + $0x8] sm:$0xff pattern:$0x75316420]  ;;  %v545_v3 = vld.sshfl [vmem:[#allocation1] sm:$0xff pattern:$0x75316420] }
 0x48d   : > { %551 = vrot.lane.b32.xlu2 %v546_v2, %s1058_s24  ;;  %549 = vrot.lane.b32.xlu1 %v545_v3, %s1058_s24 }
 0x4df   : > { %v539_v4 = vpop.permute.xlu2 %538 }
 0x4e7   : > { %v552_v12 = vpop.permute.xlu2 %551 }
 0x4f7   : > { %v541_v5 = vpop.permute.xlu0 %540 }
 0x4f8   : > { %v543_v6 = vsel %vm221_vm0, %v541_v5, %v539_v4  ;;  %v542_v9 = vsel %vm221_vm0, %v539_v4, %v541_v5 }
 0x4f9   : > { %v556_v7 = vsel %vm1200_vm1, %v543_v6, -inf  ;;  %v555_v13 = vsel %vm1208_vm2, %v542_v9, -inf }
 0x4fa   : > { %v559_v11 = vrot.slane %v556_v7, 4 }
 0x4fc   : > { %v560_v15 = vsel %vm241_vm3, %v555_v13, %v559_v11 }
 0x4fd   : > { %v562_v22 = vmax.f32 %v529_v62, %v560_v15 }
 0x4ff   : > { %v550_v14 = vpop.permute.xlu1 %549 }
 0x500   : > { %v553_v17 = vsel %vm233_vm4, %v550_v14, %v552_v12  ;;  %v554_v18 = vsel %vm233_vm4, %v552_v12, %v550_v14 }
 0x501   : > { %v564_v20 = vsel %vm1215_vm5, %v553_v17, -inf  ;;  %v563_v0 = vsel %vm1222_vm6, %v554_v18, -inf }
 0x502   : > { %v567_v21 = vrot.slane %v564_v20, 4 }
 0x504   : > { %v568_v24 = vsel %vm241_vm3, %v563_v0, %v567_v21 }
 0x505   : > { %v570_v25 = vmax.f32 %v562_v22, %v568_v24 }
 0x507   : > { %572 = vst [vmem:[#allocation1] ss:$2 sm:$0xff] %v570_v25 }
 0x50e   : > { %v574_v26 = vld.sshfl [vmem:[#allocation1 + $0x8] sm:$0xff pattern:$0x75316420]  ;;  %v573_v27 = vld.sshfl [vmem:[#allocation1] sm:$0xff pattern:$0x75316420] }
 0x50f   : > { %579 = vrot.lane.b32.xlu1 %v574_v26, %s1057_s17  ;;  %577 = vrot.lane.b32.xlu0 %v573_v27, %s1057_s17  ;;  %583 = vst [vmem:[#allocation1] ss:$2 sm:$0xff] %v570_v25 }
 0x516   : > { %v585_v28 = vld.sshfl [vmem:[#allocation1 + $0x8] sm:$0xff pattern:$0x75316420]  ;;  %v584_v29 = vld.sshfl [vmem:[#allocation1] sm:$0xff pattern:$0x75316420] }
 0x517   : > { %590 = vrot.lane.b32.xlu0 %v585_v28, %s1058_s24  ;;  %588 = vrot.lane.b32.xlu2 %v584_v29, %s1058_s24 }
 0x571   : > { %v589_v36 = vpop.permute.xlu2 %588 }
 0x581   : > { %v580_v30 = vpop.permute.xlu1 %579  ;;  %v578_v31 = vpop.permute.xlu0 %577 }
 0x582   : > { %v582_v32 = vsel %vm221_vm0, %v580_v30, %v578_v31  ;;  %v581_v34 = vsel %vm221_vm0, %v578_v31, %v580_v30 }
 0x583   : > { %v595_v33 = vsel %vm1200_vm1, %v582_v32, -inf  ;;  %v594_v37 = vsel %vm1208_vm2, %v581_v34, -inf }
 0x584   : > { %v598_v35 = vrot.slane %v595_v33, 4 }
 0x586   : > { %v599_v39 = vsel %vm241_vm3, %v594_v37, %v598_v35 }
 0x587   : > { %v601_v43 = vmax.f32 %v570_v25, %v599_v39 }
 0x589   : > { %v591_v38 = vpop.permute.xlu0 %590 }
 0x58a   : > { %v592_v40 = vsel %vm233_vm4, %v589_v36, %v591_v38  ;;  %v593_v41 = vsel %vm233_vm4, %v591_v38, %v589_v36 }
 0x58b   : > { %v603_v10 = vsel %vm1215_vm5, %v592_v40, -inf  ;;  %v602_v44 = vsel %vm1222_vm6, %v593_v41, -inf }
 0x58c   : > { %v606_v42 = vrot.slane %v603_v10, 4 }
 0x58e   : > { %v607_v16 = vsel %vm241_vm3, %v602_v44, %v606_v42 }
 0x58f   : > { %v609_v45 = vmax.f32 %v601_v43, %v607_v16 }
 0x591   : > { %611 = vst [vmem:[#allocation1] ss:$2 sm:$0xff] %v609_v45 }
 0x598   : > { %v613_v46 = vld.sshfl [vmem:[#allocation1 + $0x8] sm:$0xff pattern:$0x75316420]  ;;  %v612_v47 = vld.sshfl [vmem:[#allocation1] sm:$0xff pattern:$0x75316420] }
 0x599   : > { %618 = vrot.lane.b32.xlu2 %v613_v46, %s1059_s19  ;;  %616 = vrot.lane.b32.xlu1 %v612_v47, %s1059_s19  ;;  %622 = vst [vmem:[#allocation1] ss:$2 sm:$0xff] %v609_v45 }
 0x5a0   : > { %v624_v48 = vld.sshfl [vmem:[#allocation1 + $0x8] sm:$0xff pattern:$0x75316420]  ;;  %v623_v49 = vld.sshfl [vmem:[#allocation1] sm:$0xff pattern:$0x75316420] }
 0x5a1   : > { %629 = vrot.lane.b32.xlu1 %v624_v48, %s1060_s3  ;;  %627 = vrot.lane.b32.xlu0 %v623_v49, %s1060_s3 }
 0x5f3   : > { %v619_v19 = vpop.permute.xlu2 %618 }
 0x60b   : > { %v617_v23 = vpop.permute.xlu1 %616 }
 0x60c   : > { %v621_v50 = vsel %vm302_vm7, %v619_v19, %v617_v23  ;;  %v620_v53 = vsel %vm302_vm7, %v617_v23, %v619_v19 }
 0x60d   : > { %v634_v51 = vsel %vm208_vm8, %v621_v50, -inf }
 0x60e   : > { %v637_v52 = vrot.slane %v634_v51, 4 }
 0x610   : > { %v638_v54 = vsel %vm241_vm3, %v620_v53, %v637_v52 }
 0x611   : > { %v640_v62 = vmax.f32 %v609_v45, %v638_v54 }
 0x613   : > { %v630_v55 = vpop.permute.xlu1 %629  ;;  %v628_v56 = vpop.permute.xlu0 %627 }
 0x614   : > { %v631_v57 = vsel %vm314_vm9, %v628_v56, %v630_v55  ;;  %v632_v59 = vsel %vm314_vm9, %v630_v55, %v628_v56 }
 0x615   : > { %v641_v60 = vsel %vm205_vm10, %v632_v59, -inf  ;;  %v645_v61 = vrot.slane %v631_v57, 4 }
 0x617   : > { %v646_v63 = vsel %vm241_vm3, %v641_v60, %v645_v61 }
 0x618   : > { %v648_v1 = vmax.f32 %v640_v62, %v646_v63 }
 0x61a   : > { %650 = vst [vmem:[#allocation1] ss:$2 sm:$0xff] %v648_v1 }
 0x621   : > { %v652_v2 = vld.sshfl [vmem:[#allocation1 + $0x8] sm:$0xff pattern:$0x75316420]  ;;  %v651_v3 = vld.sshfl [vmem:[#allocation1] sm:$0xff pattern:$0x75316420] }
 0x622   : > { %657 = vrot.lane.b32.xlu0 %v652_v2, %s1059_s19  ;;  %655 = vrot.lane.b32.xlu2 %v651_v3, %s1059_s19  ;;  %661 = vst [vmem:[#allocation1] ss:$2 sm:$0xff] %v648_v1 }
 0x629   : > { %v663_v4 = vld.sshfl [vmem:[#allocation1 + $0x8] sm:$0xff pattern:$0x75316420]  ;;  %v662_v5 = vld.sshfl [vmem:[#allocation1] sm:$0xff pattern:$0x75316420] }
 0x62a   : > { %668 = vrot.lane.b32.xlu2 %v663_v4, %s1060_s3  ;;  %666 = vrot.lane.b32.xlu1 %v662_v5, %s1060_s3 }
 0x67c   : > { %v656_v6 = vpop.permute.xlu2 %655 }
 0x684   : > { %v669_v14 = vpop.permute.xlu2 %668 }
 0x694   : > { %v658_v7 = vpop.permute.xlu0 %657 }
 0x695   : > { %v660_v9 = vsel %vm302_vm7, %v658_v7, %v656_v6  ;;  %v659_v13 = vsel %vm302_vm7, %v656_v6, %v658_v7 }
 0x696   : > { %v673_v11 = vsel %vm208_vm8, %v660_v9, -inf }
 0x697   : > { %v676_v12 = vrot.slane %v673_v11, 4 }
 0x699   : > { %v677_v15 = vsel %vm241_vm3, %v659_v13, %v676_v12 }
 0x69a   : > { %v679_v22 = vmax.f32 %v648_v1, %v677_v15 }
 0x69c   : > { %v667_v17 = vpop.permute.xlu1 %666 }
 0x69d   : > { %v670_v18 = vsel %vm314_vm9, %v667_v17, %v669_v14  ;;  %v671_v58 = vsel %vm314_vm9, %v669_v14, %v667_v17 }
 0x69e   : > { %v680_v20 = vsel %vm205_vm10, %v671_v58, -inf  ;;  %v684_v21 = vrot.slane %v670_v18, 4 }
 0x6a0   : > { %v685_v0 = vsel %vm241_vm3, %v680_v20, %v684_v21 }
 0x6a1   : > { %v687_v24 = vmax.f32 %v679_v22, %v685_v0 }
 0x6a3   : > { %821 = vst [vmem:[%s1284_s5 + $0x18] sm:$0xff] %v687_v24 }
 0x6a4   : > { %995 = shalt.err (!%p992_p0)
}
 0x6a5   : > { %s1061_s25 = smov 128   ;;  %s1062_s19 = smov 8  }
 0x6a6   : > { %835 = dma.vmem_to_hbm [thread:$0]  (%p1157_p5), %s706_s12, 512, %s708_s21, %s691_s22, %s1061_s25, %s1061_s25, %s1062_s19  }
 0x6a7 PF: > { %s722_s3 = sand.u32 1, %s1034_s9   ;;  %p846_p3 = pnand %p811_p9, %p1127_p6 }
 0x6a8   : > { %s723_s4 = scalar_lea.sflag [#allocation4], %s722_s3 }
 0x6a9   : > { %p847_p7 = pneg %p846_p3 }
 0x6ab   : > { %1029 = dma.done.wait (%p847_p7), %s723_s4, 512  }
 0x6ac   : > { %1031 = vsyncadd (%p847_p7), %s723_s4, 4294966784  ;;  %s19_s14 = sadd.s32 1, %s1054_s14   ;;  %s1526_s9 = smov %s1038_s10 }
 0x6ad   : > { %p16_p10 = scmp.ge.s32.totalorder %s19_s14, 4   ;;  %s1527_s10 = smov %s1042_s11 }
 0x6ae   : > { %s1528_s11 = smov %s1166_s6  ;;  %s1529_s12 = smov %s1050_s13 }
 0x6af   : > { %s1530_s13 = smov %s1532_s27  ;;  %18 = sbr.rel (!%p16_p10) target bundleno = 7 (0x7), region = 81 }
 0x6b4   :  { %729 = vsyncpa [#allocation3], 1 }
 0x6b5   :  { %731 = vsyncpa [#allocation3 + $0x1], 1 }
 0x6b6   :  { %732 = vsyncpa [#allocation6], 1 }
 0x6b7   :  { %734 = vsyncpa [#allocation6 + $0x1], 1 }
 0x6b8   :  { %735 = vsyncpa [#allocation4], 1 }
 0x6b9   :  { %737 = vsyncpa [#allocation4 + $0x1], 1 }

</bundles_post_ra>
